<compile_context>
chip_gen: v6e
topology: v6e:2x2x1
jax: 0.10.0
libtpu: 0.0.40
codegen_flags: <defaults>
</compile_context>

<pallas_src>
from functools import partial

import numpy as np
import jax
import jax.numpy as jnp
from jax import lax
from jax.experimental import pallas as pl
from jax.experimental.pallas import tpu as pltpu


# ---------------------------------------------------------------------------
# Pallas kernel: fused squeeze + excitation + scale for Bt batch elements.
# ---------------------------------------------------------------------------
def _se_kernel(x_ref, w1_ref, w2t_ref, o_ref, *, inv_hw):
    x = x_ref[...]                                              # [Bt, C, HW]

    # Squeeze: global average pool over HW (lane reduction), fp32 accumulate.
    y = jnp.sum(x.astype(jnp.float32), axis=2) * inv_hw         # [Bt, C]

    # Excitation MLP, batched over Bt (MXU sees N=Bt / N=C, not N=1).
    # h = y @ w1^T  (w1 is PyTorch fc1 weight [Cr, C], lane-dense, contract C)
    h = lax.dot_general(y, w1_ref[...],
                        dimension_numbers=(((1,), (1,)), ((), ())),
                        preferred_element_type=jnp.float32)     # [Bt, Cr]
    h = jnp.maximum(h, 0.0)                                     # ReLU
    # s = h @ w2^T  (w2t = fc2 weight pre-transposed to [Cr, C], lane-dense)
    s = jnp.dot(h, w2t_ref[...],
                preferred_element_type=jnp.float32)             # [Bt, C]
    s = jax.nn.sigmoid(s)                                       # EUP

    # Scale: per-(b, c) gate broadcast across all HW lanes (lane-dense store).
    gate = s.astype(x.dtype)[:, :, None]                        # [Bt, C, 1]
    o_ref[...] = (x * gate).astype(o_ref.dtype)


# ---------------------------------------------------------------------------
# Wrapper
# ---------------------------------------------------------------------------
def _pick_batch_tile(B, bytes_per_sample, target_bytes=2 << 20):
    """Biggest Bt with ~target-sized blocks, >=2 grid steps when B >= 2 (v7x)."""
    bt = max(1, min(B, target_bytes // max(1, bytes_per_sample)))
    if B >= 2:
        bt = min(bt, B // 2)          # keep 2+ steps so v7x's 2nd TC has work
    while B % bt:
        bt -= 1
    return max(1, bt)


def se_block_pallas(x, w1, w2):
    """x: [B, C, H, W] (NCHW). w1: fc1 weight [C//r, C]. w2: fc2 weight [C, C//r]."""
    B, C, H, W = x.shape
    Cr = w1.shape[0]
    HW = H * W

    x2 = x.reshape(B, C, HW)                  # free view: spatial onto lanes
    w1f = w1.astype(jnp.float32)              # [Cr, C]  lane-dense
    w2t = w2.astype(jnp.float32).T            # [Cr, C]  lane-dense (tiny transpose)

    Bt = _pick_batch_tile(B, C * HW * x.dtype.itemsize)
    grid = (B // Bt,)

    kernel = partial(_se_kernel, inv_hw=1.0 / HW)
    out = pl.pallas_call(
        kernel,
        out_shape=jax.ShapeDtypeStruct((B, C, HW), x.dtype),
        grid=grid,
        in_specs=[
            pl.BlockSpec((Bt, C, HW), lambda b: (b, 0, 0)),
            pl.BlockSpec((Cr, C), lambda b: (0, 0)),   # constant block: DMA'd once
            pl.BlockSpec((Cr, C), lambda b: (0, 0)),   # constant block: DMA'd once
        ],
        out_specs=pl.BlockSpec((Bt, C, HW), lambda b: (b, 0, 0)),
        compiler_params=pltpu.CompilerParams(
            dimension_semantics=("parallel",),
            vmem_limit_bytes=32 * 1024 * 1024),
    )(x2, w1f, w2t)
    return out.reshape(B, C, H, W)


# ---------------------------------------------------------------------------
# Pure-JAX reference (mirrors the PyTorch forward; bias=False Linears).
# ---------------------------------------------------------------------------
def se_block_ref(x, w1, w2):
    y = x.mean(axis=(2, 3))                        # [B, C]
    h = jnp.maximum(y @ w1.T, 0.0)                 # Linear(C, C//r) + ReLU
    s = jax.nn.sigmoid(h @ w2.T)                   # Linear(C//r, C) + Sigmoid
    return x * s[:, :, None, None]


# ---------------------------------------------------------------------------
# Main
# ---------------------------------------------------------------------------
if __name__ == "__main__":
    B, C, H, W = 2, 128, 16, 16      # C=128, HW=256: lane-dense tiles
    reduction = 16
    Cr = C // reduction

    key = jax.random.PRNGKey(0)
    kx, k1, k2 = jax.random.split(key, 3)
    x = jax.random.normal(kx, (B, C, H, W), jnp.float32)
    # PyTorch nn.Linear weight layouts: fc1 weight [C//r, C], fc2 weight [C, C//r].
    w1 = jax.random.normal(k1, (Cr, C), jnp.float32) * 0.05
    w2 = jax.random.normal(k2, (C, Cr), jnp.float32) * 0.05

    out = jax.block_until_ready(se_block_pallas(x, w1, w2))
    ref = jax.block_until_ready(se_block_ref(x, w1, w2))

    assert out.shape == x.shape and out.dtype == x.dtype
    np.testing.assert_allclose(np.asarray(out), np.asarray(ref),
                               rtol=2e-3, atol=2e-3)
    print("KERNEL_OK")
</pallas_src>

<mosaic_0001>
module attributes {stable_mosaic.version = 11 : i64} {
  func.func @_se_kernel(%arg0: i32, %arg1: memref<1x128x256xf32, #tpu.memory_space<vmem>>, %arg2: memref<8x128xf32, #tpu.memory_space<vmem>>, %arg3: memref<8x128xf32, #tpu.memory_space<vmem>>, %arg4: memref<1x128x256xf32, #tpu.memory_space<vmem>>) attributes {dimension_semantics = [#tpu.dimension_semantics<parallel>], iteration_bounds = array<i64: 2>, scalar_prefetch = 0 : i64, scratch_operands = 0 : i64, tpu.core_type = #tpu.core_type<tc>, window_params = [{transform_indices = @transform_0, window_bounds = array<i64: 1, 128, 256>}, {pipeline_mode = #tpu.pipeline_mode<synchronous>, transform_indices = @transform_1, window_bounds = array<i64: 8, 128>}, {pipeline_mode = #tpu.pipeline_mode<synchronous>, transform_indices = @transform_2, window_bounds = array<i64: 8, 128>}, {transform_indices = @transform_3, window_bounds = array<i64: 1, 128, 256>}]} {
    %c0 = arith.constant 0 : index
    %c0_0 = arith.constant 0 : index
    %c0_1 = arith.constant 0 : index
    %0 = vector.load %arg1[%c0, %c0_0, %c0_1] : memref<1x128x256xf32, #tpu.memory_space<vmem>>, vector<1x128x256xf32>
    %cst = arith.constant dense<0.000000e+00> : vector<1x128xf32>
    %1 = vector.multi_reduction <add>, %0, %cst [2] : vector<1x128x256xf32> to vector<1x128xf32>
    %cst_2 = arith.constant 3.906250e-03 : f32
    %2 = vector.broadcast %cst_2 : f32 to vector<1x128xf32>
    %3 = arith.mulf %1, %2 : vector<1x128xf32>
    %c0_3 = arith.constant 0 : index
    %c0_4 = arith.constant 0 : index
    %4 = vector.load %arg2[%c0_3, %c0_4] : memref<8x128xf32, #tpu.memory_space<vmem>>, vector<8x128xf32>
    %cst_5 = arith.constant dense<0.000000e+00> : vector<1x8xf32>
    %5 = tpu.matmul %3, %4, %cst_5 {dimension_numbers = #tpu.dot_dimension_numbers<[1], [1], [0], [0], [0, 0, 1, 0], [], []>} : vector<1x128xf32>, vector<8x128xf32>, vector<1x8xf32> -> vector<1x8xf32>
    %cst_6 = arith.constant 0.000000e+00 : f32
    %6 = vector.broadcast %cst_6 : f32 to vector<1x8xf32>
    %7 = arith.maximumf %5, %6 : vector<1x8xf32>
    %c0_7 = arith.constant 0 : index
    %c0_8 = arith.constant 0 : index
    %8 = vector.load %arg3[%c0_7, %c0_8] : memref<8x128xf32, #tpu.memory_space<vmem>>, vector<8x128xf32>
    %cst_9 = arith.constant dense<0.000000e+00> : vector<1x128xf32>
    %9 = tpu.matmul %7, %8, %cst_9 {dimension_numbers = #tpu.dot_dimension_numbers<[1], [0], [0], [1], [0, 0, 1, 1], [], []>} : vector<1x8xf32>, vector<8x128xf32>, vector<1x128xf32> -> vector<1x128xf32>
    %10 = arith.negf %9 : vector<1x128xf32>
    %11 = math.exp %10 : vector<1x128xf32>
    %cst_10 = arith.constant 1.000000e+00 : f32
    %12 = vector.broadcast %cst_10 : f32 to vector<1x128xf32>
    %13 = arith.addf %12, %11 : vector<1x128xf32>
    %14 = arith.divf %12, %13 : vector<1x128xf32>
    %15 = vector.shape_cast %14 : vector<1x128xf32> to vector<1x128x1xf32>
    %16 = vector.broadcast %15 : vector<1x128x1xf32> to vector<1x128x256xf32>
    %17 = arith.mulf %0, %16 : vector<1x128x256xf32>
    %c0_11 = arith.constant 0 : index
    %c0_12 = arith.constant 0 : index
    %c0_13 = arith.constant 0 : index
    %18 = vector.load %arg4[%c0_11, %c0_12, %c0_13] : memref<1x128x256xf32, #tpu.memory_space<vmem>>, vector<1x128x256xf32>
    tpu.vector_store %arg4[%c0_11, %c0_12, %c0_13], %17 {strides = array<i32>} : memref<1x128x256xf32, #tpu.memory_space<vmem>>, vector<1x128x256xf32>,
    return
  }
  func.func @transform_0(%arg0: i32) -> (i32, i32, i32) {
    %c0_i32 = arith.constant 0 : i32
    %c0_i32_0 = arith.constant 0 : i32
    %c0_i32_1 = arith.constant 0 : i32
    return %arg0, %c0_i32, %c0_i32_0 : i32, i32, i32
  }
  func.func @transform_1(%arg0: i32) -> (i32, i32) {
    %c0_i32 = arith.constant 0 : i32
    %c0_i32_0 = arith.constant 0 : i32
    %c0_i32_1 = arith.constant 0 : i32
    return %c0_i32, %c0_i32_0 : i32, i32
  }
  func.func @transform_2(%arg0: i32) -> (i32, i32) {
    %c0_i32 = arith.constant 0 : i32
    %c0_i32_0 = arith.constant 0 : i32
    %c0_i32_1 = arith.constant 0 : i32
    return %c0_i32, %c0_i32_0 : i32, i32
  }
  func.func @transform_3(%arg0: i32) -> (i32, i32, i32) {
    %c0_i32 = arith.constant 0 : i32
    %c0_i32_0 = arith.constant 0 : i32
    %c0_i32_1 = arith.constant 0 : i32
    return %arg0, %c0_i32, %c0_i32_0 : i32, i32, i32
  }
}

</mosaic_0001>

<bundles_post_ra>
// kernel: tpu_custom_call.1
= control target key start
LH: loop header
LB: loop body
LE: loop exit
PB: predicated region body
PF: predicated region fallthrough
CT: control target
= control target key end

     0   :  { %8 = vsyncpa [#allocation3], 0  ;;  %s1552_s0 = inlined_call_operand.hbm [shape: f32[2,128,256], index: 0, kind: input, shape index: {}]   ;;  %s1553_s1 = inlined_call_operand.hbm [shape: f32[8,128], index: 1, kind: input, shape index: {}]   ;;  %s1554_s2 = inlined_call_operand.hbm [shape: f32[8,128], index: 2, kind: input, shape index: {}]   ;;  %s1555_s3 = inlined_call_operand.hbm [shape: f32[2,128,256], index: 3, kind: output, shape index: {}]  }
   0x1   :  { %10 = vsyncpa [#allocation3 + $0x1], 0 }
   0x2   :  { %11 = vsyncpa [#allocation6], 0 }
   0x3   :  { %12 = vsyncpa [#allocation4], 0 }
   0x4   :  { %14 = vsyncpa [#allocation4 + $0x1], 0  ;;  %s1121_s12 = smov 0   ;;  %s1123_s13 = smov 0  }
   0x5   :  { %s1125_s14 = smov 0   ;;  %s1127_s15 = smov 0  }
   0x6 LB: > { %s1142_s16 = sadd.s32 4294967295, %s1089_s15   ;;  %s828_s17 = sadd.s32 4294967294, %s1089_s15   ;;  %s1089_s15 = sphi %s1127_s15, %s1578_s15   ;;  %s1085_s14 = sphi %s1125_s14, %s1577_s14   ;;  %s1081_s13 = sphi %s1123_s13, %s1576_s13   ;;  %s1077_s12 = sphi %s1121_s12, %s1575_s12  }
   0x7   : > { %s1146_s18 = sadd.s32 1, %s1089_s15   ;;  %s27_s19 = sadd.s32 1, %s1085_s14 }
   0x8   : > { %s24_s20 = ssub.s32 %s1089_s15, %s1146_s18  ;;  %p34_p0 = scmp.ne.s32.totalorder %s1085_s14, %s1081_s13 }
   0x9   : > { %p25_p1 = scmp.eq.s32.totalorder %s24_s20, 0  ;;  %p35_p2 = scmp.eq.s32.totalorder %s1089_s15, 0 }
   0xa   : > { %p40_p3 = scmp.ne.s32.totalorder %s1081_s13, %s1077_s12  ;;  %p1556_p4 = scmp.eq.s32.totalorder %s1142_s16, 0 }
   0xb   : > { %s1158_s21 = scalar_select %p25_p1, %s1085_s14, %s27_s19  }
   0xc   : > { %p1160_p5 = por %p35_p2, %p34_p0  ;;  %p1166_p6 = por %p1556_p4, %p40_p3 }
   0xd   : > { %p106_p7 = scmp.eq.s32.totalorder %s1142_s16, 1  ;;  %p112_p8 = scmp.eq.s32.totalorder %s828_s17, 1 }
   0xe   : > { %s1561_s23 = scalar_select %p1166_p6, 1, 0 }
   0xf   : > { %p829_p9 = scmp.ge.s32.totalorder %s1089_s15, 1  ;;  %p119_p10 = scmp.lt.s32.totalorder %s1089_s15, 3 }
  0x10   : > { %p1173_p11 = por %p106_p7, %p34_p0  ;;  %p1177_p12 = por %p112_p8, %p40_p3 }
  0x11   : > { %p1181_p13 = pnand %p829_p9, %p119_p10  ;;  %s1091_s27 = smov [#allocation5]  }
  0x12   : > { %s1562_s24 = scalar_select %p1173_p11, 1, 0 }
  0x13   : > { %s1563_s25 = scalar_select %p1177_p12, 1, 0 }
  0x14   : > { %s1564_s26 = scalar_select %p1181_p13, 1, 0 }
  0x15   : > { %p876_p2 = pneg %p1181_p13  ;;  %s132_s28 = sshll.u32 %s1091_s27, 4  ;;  %s133_s28 = int_to_ptr.vmem [resolvable:$true] %s132_s28 }
  0x16   : > { %p893_p4 = scmp.lt.s32.totalorder %s1089_s15, 2  ;;  %p1565_p0 = scmp.eq.s32.totalorder %s1142_s16, 0 }
  0x17   : > { %s1092_s4 = smov [#allocation7]   ;;  %s952_s6 = scalar_lea.vmem %s133_s28, 128 }
  0x18   : > { %p1191_p7 = pnand %p876_p2, %p1565_p0  ;;  %p1197_p3 = pnand %p893_p4, %p1160_p5 }
  0x19   : > { %s143_s5 = sshll.u32 %s1092_s4, 4  ;;  %p953_p9 = scmp.ne.s32.totalorder %s133_s28, %s952_s6  ;;  %s144_s5 = int_to_ptr.vmem [resolvable:$true] %s143_s5 }
  0x1a   : > { %p943_p8 = pneg %p1191_p7  ;;  %p960_p0 = scmp.lt.s32.totalorder %s133_s28, %s133_s28 }
  0x1b   : > { %p961_p1 = scmp.lt.s32.totalorder %s952_s6, %s952_s6 }
  0x1c   : > { %p955_p10 = pnand %p953_p9, %p943_p8 }
  0x1d   : > { %p962_p12 = por %p961_p1, %p960_p0 }
  0x1e   : > { %p956_p2 = pneg %p955_p10 }
  0x20   : > { %p963_p11 = pnand %p962_p12, %p956_p2 }
  0x22   : > { %966 = shalt.err (!%p963_p11)
}
  0x23   : > { %879 = dma.hbm_to_vmem [thread:$0]  (!%p1191_p7), %s1553_s1, 128, %s133_s28, [#allocation6]  }
  0x24   : > { %s154_s9 = sand.u32 1, %s1085_s14   ;;  %s978_s10 = scalar_lea.vmem %s144_s5, 128 }
  0x25   : > { %p979_p4 = scmp.ne.s32.totalorder %s144_s5, %s978_s10  ;;  %p986_p10 = scmp.lt.s32.totalorder %s144_s5, %s144_s5 }
  0x26   : > { %p987_p6 = scmp.lt.s32.totalorder %s978_s10, %s978_s10 }
  0x27   : > { %p981_p5 = pnand %p979_p4, %p943_p8 }
  0x28   : > { %p988_p1 = por %p987_p6, %p986_p10 }
  0x29   : > { %p982_p9 = pneg %p981_p5 }
  0x2b   : > { %p989_p12 = pnand %p988_p1, %p982_p9 }
  0x2d   : > { %992 = shalt.err (!%p989_p12)
}
  0x2e   : > { %882 = dma.hbm_to_vmem [thread:$0]  (!%p1191_p7), %s1554_s2, 128, %s144_s5, [#allocation6]  }
  0x2f   : > { %s833_s19 = sshll.u32 %s154_s9, 8  ;;  %s848_s20 = sshll.u32 %s1089_s15, 12 }
  0x30   : > { %s1224_s28 = scalar_lea.hbm %s1552_s0, %s848_s20  ;;  %s158_s4 = scalar_lea.vmem [#allocation2], %s833_s19 }
  0x31   : > { %s165_s6 = sshll.u32 %s158_s4, 4  ;;  %s1228_s29 = scalar_lea.sflag [#allocation3], %s154_s9  ;;  %s1226_s6 = int_to_ptr.vmem [resolvable:$true] %s165_s6 }
  0x32   : > { %s993_s7 = scalar_lea.hbm %s1224_s28, 4096  ;;  %p995_p11 = pneg %p1197_p3 }
  0x33   : > { %p994_p6 = scmp.ne.s32.totalorder %s1224_s28, %s993_s7  ;;  %s998_s10 = scalar_lea.hbm %s1552_s0, 8192 }
  0x34   : > { %p999_p2 = scmp.lt.s32.totalorder %s1224_s28, %s1552_s0  ;;  %p1000_p0 = scmp.lt.s32.totalorder %s998_s10, %s993_s7 }
  0x35   : > { %p996_p7 = pnand %p995_p11, %p994_p6 }
  0x36   : > { %p1001_p4 = por %p1000_p0, %p999_p2 }
  0x37   : > { %p997_p8 = pneg %p996_p7 }
  0x39   : > { %p1002_p5 = pnand %p1001_p4, %p997_p8 }
  0x3b   : > { %1005 = shalt.err (!%p1002_p5)
}
  0x3c   : > { %s1006_s9 = scalar_lea.vmem %s1226_s6, 4096  ;;  %s1093_s19 = smov [#allocation2]  }
  0x3d   : > { %p1007_p9 = scmp.ne.s32.totalorder %s1226_s6, %s1006_s9  ;;  %s1011_s20 = sshll.u32 %s1093_s19, 4  ;;  %s1012_s20 = int_to_ptr.vmem [resolvable:$false] %s1011_s20 }
  0x3e   : > { %s1013_s22 = scalar_lea.vmem %s1012_s20, 8192  ;;  %p1014_p12 = scmp.lt.s32.totalorder %s1226_s6, %s1012_s20 }
  0x3f   : > { %p1009_p10 = pnand %p1007_p9, %p995_p11  ;;  %p1015_p6 = scmp.lt.s32.totalorder %s1013_s22, %s1006_s9 }
  0x41   : > { %p1010_p1 = pneg %p1009_p10  ;;  %p1016_p7 = por %p1015_p6, %p1014_p12 }
  0x43   : > { %p1017_p13 = pnand %p1016_p7, %p1010_p1 }
  0x45   : > { %1020 = shalt.err (!%p1017_p13)
}
  0x46   : > { %s1094_s27 = smov 256   ;;  %s1095_s4 = smov 16  }
  0x47   : > { %886 = dma.hbm_to_vmem [thread:$0]  (!%p1197_p3), %s1224_s28, 4096, %s1226_s6, %s1228_s29, %s1094_s27, %s1094_s27, %s1095_s4  }
  0x48   : > { %p1568_p11 = scmp.ne.s32.totalorder %s1564_s26, 0 }
  0x49   : > { %s1252_s7 = sand.u32 (!%p1568_p11), 1, %s1081_s13   ;;  %p1569_p13 = scmp.ne.s32.totalorder (!%p1568_p11), %s1561_s23, 0 }
  0x4a   : > { %177 = sbr.rel (%p1568_p11) target bundleno = 843 (0x34b), region = 32  ;;  %s837_s5 = sshll.u32 (!%p1568_p11), %s1252_s7, 8 }
  0x4b   : > { %s180_s8 = scalar_lea.sflag (!%p1568_p11), [#allocation3], %s1252_s7  ;;  %s1258_s10 = scalar_lea.vmem (!%p1568_p11), [#allocation2], %s837_s5 }
  0x4f   : > { %1064 = dma.done.wait (%p1569_p13), %s180_s8, 4096  }
  0x50   : > { %1066 = vsyncadd (%p1569_p13), %s180_s8, 4294963200  ;;  %p1570_p3 = scmp.eq.s32.totalorder %s1142_s16, 0 }
  0x52   : > { %1068 = dma.done.wait (%p1570_p3), [#allocation6], 256   ;;  %p1571_p8 = pmov %p1570_p3 }
  0x53   : > { %v1269_v0 = vld [vmem:[%s1258_s10] sm:$0xff]  ;;  %v1272_v1 = vld [vmem:[%s1258_s10 + $0x8] sm:$0xff]  ;;  %v1283_v5 = vld [vmem:[%s1258_s10 + $0x10] sm:$0xff]  ;;  %v1096_v48 = vmov 0.0   ;;  %vm1097_vm0 = vmmov 0   ;;  %v327_v50 = vlaneseq  ;;  %vm338_vm1 = vcmask 130112  }
  0x54   : > { %1070 = vsyncadd (%p1571_p8), [#allocation6], 4294967040  ;;  %v1275_v2 = vld [vmem:[%s1258_s10 + $0x20] sm:$0xff]  ;;  %v246_v3 = vadd.f32 %v1272_v1, %v1269_v0  ;;  %v1280_v4 = vld [vmem:[%s1258_s10 + $0x28] sm:$0xff]  ;;  %854 = vmatprep.subr.mxu0 %v1096_v48  ;;  %859 = vmatprep.subr.mxu1 %v1096_v48  ;;  %vm345_vm2 = vcmask 195712   ;;  %vm352_vm3 = vcmask 261312  }
  0x55   : > { %v1286_v6 = vld [vmem:[%s1258_s10 + $0x18] sm:$0xff]  ;;  %v252_v7 = vadd.f32 %v1280_v4, %v1275_v2  ;;  %v1291_v8 = vld [vmem:[%s1258_s10 + $0x30] sm:$0xff]  ;;  %v1301_v12 = vld [vmem:[%s1258_s10 + $0x40] sm:$0xff]  ;;  %856 = vmatprep.mubr.msk.f32.mxu0 %vm1097_vm0, %v1096_v48  ;;  %861 = vmatprep.mubr.msk.f32.mxu1 %vm1097_vm0, %v1096_v48  ;;  %v1396_v51 = vand.u32 127, %v327_v50  ;;  %v1398_v52 = vshrl.u32 %v327_v50, 7  ;;  %vm359_vm4 = vcmask 326912  }
  0x56   : > { %v1294_v9 = vld [vmem:[%s1258_s10 + $0x38] sm:$0xff]  ;;  %247 = vadd.xlane.f32.xlu0 %v246_v3  ;;  %v249_v10 = vadd.f32 %v1286_v6, %v1283_v5  ;;  %v1304_v13 = vld [vmem:[%s1258_s10 + $0x48] sm:$0xff]  ;;  %v1307_v14 = vld [vmem:[%s1258_s10 + $0x50] sm:$0xff]  ;;  %vm366_vm5 = vcmask 392512   ;;  %vm373_vm6 = vcmask 458112   ;;  %vm380_vm7 = vcmask 523712  }
  0x57   : > { %253 = vadd.xlane.f32.xlu1 %v252_v7  ;;  %v255_v11 = vadd.f32 %v1294_v9, %v1291_v8  ;;  %v1310_v15 = vld [vmem:[%s1258_s10 + $0x58] sm:$0xff]  ;;  %v258_v16 = vadd.f32 %v1304_v13, %v1301_v12  ;;  %v1317_v18 = vld [vmem:[%s1258_s10 + $0x60] sm:$0xff]  ;;  %v1320_v19 = vld [vmem:[%s1258_s10 + $0x68] sm:$0xff]  ;;  %v333_v53 = vadd.s32 4294967288, %v1396_v51  ;;  %v340_v55 = vadd.s32 4294967280, %v1396_v51  ;;  %s1440_s23 = scalar_lea.vmem [#allocation8], %s837_s5 }
  0x58   : > { %v261_v17 = vadd.f32 %v1310_v15, %v1307_v14  ;;  %v1323_v20 = vld [vmem:[%s1258_s10 + $0x70] sm:$0xff]  ;;  %v1326_v21 = vld [vmem:[%s1258_s10 + $0x78] sm:$0xff]  ;;  %v264_v22 = vadd.f32 %v1320_v19, %v1317_v18  ;;  %v1333_v24 = vld [vmem:[%s1258_s10 + $0x80] sm:$0xff]  ;;  %v347_v56 = vadd.s32 4294967272, %v1396_v51  ;;  %v331_v58 = vsub.s32 %v1396_v51, %v1398_v52  ;;  %s849_s26 = sshll.u32 %s1142_s16, 12  ;;  %s736_s30 = sshll.u32 %s1440_s23, 4  ;;  %s1505_s30 = int_to_ptr.vmem [resolvable:$true] %s736_s30 }
  0x59   : > { %v267_v23 = vadd.f32 %v1326_v21, %v1323_v20  ;;  %v1336_v25 = vld [vmem:[%s1258_s10 + $0x88] sm:$0xff]  ;;  %v1339_v26 = vld [vmem:[%s1258_s10 + $0x90] sm:$0xff]  ;;  %v1342_v27 = vld [vmem:[%s1258_s10 + $0x98] sm:$0xff]  ;;  %v336_v60 = vsub.s32 %v333_v53, %v1398_v52  ;;  %v354_v61 = vadd.s32 4294967264, %v1396_v51  ;;  %v343_v62 = vsub.s32 %v340_v55, %v1398_v52  ;;  %s1503_s29 = scalar_lea.hbm %s1555_s3, %s849_s26  ;;  %s723_s16 = scalar_lea.sflag [#allocation4], %s1252_s7 }
  0x5a   : > { %250 = vadd.xlane.f32.xlu0 %v249_v10  ;;  %v270_v28 = vadd.f32 %v1336_v25, %v1333_v24  ;;  %v273_v29 = vadd.f32 %v1342_v27, %v1339_v26  ;;  %v1349_v30 = vld [vmem:[%s1258_s10 + $0xa0] sm:$0xff]  ;;  %v1352_v31 = vld [vmem:[%s1258_s10 + $0xa8] sm:$0xff]  ;;  %v1355_v32 = vld [vmem:[%s1258_s10 + $0xb0] sm:$0xff]  ;;  %v350_v7 = vsub.s32 %v347_v56, %v1398_v52  ;;  %v361_v10 = vadd.s32 4294967256, %v1396_v51  ;;  %s1021_s11 = scalar_lea.vmem %s1505_s30, 4096  ;;  %p1572_p0 = scmp.ne.s32.totalorder %s1562_s24, 0 }
  0x5b   : > { %256 = vadd.xlane.f32.xlu1 %v255_v11  ;;  %v1358_v33 = vld [vmem:[%s1258_s10 + $0xb8] sm:$0xff]  ;;  %v276_v34 = vadd.f32 %v1352_v31, %v1349_v30  ;;  %v1365_v36 = vld [vmem:[%s1258_s10 + $0xc0] sm:$0xff]  ;;  %v1368_v37 = vld [vmem:[%s1258_s10 + $0xc8] sm:$0xff]  ;;  %vm387_vm8 = vcmask 589312   ;;  %vm394_vm9 = vcmask 654912   ;;  %vm401_vm10 = vcmask 720512   ;;  %p1022_p2 = scmp.ne.s32.totalorder %s1505_s30, %s1021_s11 }
  0x5c   : > { %v279_v35 = vadd.f32 %v1358_v33, %v1355_v32  ;;  %v1371_v38 = vld [vmem:[%s1258_s10 + $0xd0] sm:$0xff]  ;;  %v1374_v39 = vld [vmem:[%s1258_s10 + $0xd8] sm:$0xff]  ;;  %v282_v40 = vadd.f32 %v1368_v37, %v1365_v36  ;;  %v1381_v42 = vld [vmem:[%s1258_s10 + $0xe0] sm:$0xff]  ;;  %vm408_vm11 = vcmask 786112   ;;  %vm415_vm12 = vcmask 851712   ;;  %s1098_s17 = smov [#allocation8]  }
  0x5d   : > { %v285_v41 = vadd.f32 %v1374_v39, %v1371_v38  ;;  %v1384_v43 = vld [vmem:[%s1258_s10 + $0xe8] sm:$0xff]  ;;  %v1387_v44 = vld [vmem:[%s1258_s10 + $0xf0] sm:$0xff]  ;;  %v1390_v45 = vld [vmem:[%s1258_s10 + $0xf8] sm:$0xff]  ;;  %vm422_vm13 = vcmask 917312   ;;  %vm429_vm14 = vcmask 982912   ;;  %vm436_vm15 = vcmask 1048512   ;;  %p1023_p4 = pnand %p1022_p2, %p1572_p0 }
  0x5e   : > { %259 = vadd.xlane.f32.xlu0 %v258_v16  ;;  %v288_v46 = vadd.f32 %v1384_v43, %v1381_v42  ;;  %v291_v47 = vadd.f32 %v1390_v45, %v1387_v44  ;;  %v310_v49 = vld [vmem:[#allocation5] sm:$0xff]  ;;  %vm511_vm0 = vcmask 64512   ;;  %s1025_s9 = sshll.u32 %s1098_s17, 4  ;;  %s1026_s9 = int_to_ptr.vmem [resolvable:$false] %s1025_s9 }
  0x5f   : > { %262 = vadd.xlane.f32.xlu1 %v261_v17  ;;  %855 = vmatpush3.xpose.msra.mxu0 %v310_v49  ;;  %p1024_p5 = pneg %p1023_p4  ;;  %s1027_s19 = scalar_lea.vmem %s1026_s9, 8192 }
  0x60   : > { %p1028_p9 = scmp.lt.s32.totalorder %s1505_s30, %s1026_s9  ;;  %p1029_p10 = scmp.lt.s32.totalorder %s1027_s19, %s1021_s11 }
  0x62   : > { %265 = vadd.xlane.f32.xlu0 %v264_v22  ;;  %p1030_p1 = por %p1029_p10, %p1028_p9 }
  0x63   : > { %268 = vadd.xlane.f32.xlu1 %v267_v23 }
  0x64   : > { %p1031_p12 = pnand %p1030_p1, %p1024_p5 }
  0x66   : > { %271 = vadd.xlane.f32.xlu0 %v270_v28  ;;  %v357_v28 = vsub.s32 %v354_v61, %v1398_v52  ;;  %v389_v61 = vadd.s32 4294967224, %v1396_v51 }
  0x67   : > { %274 = vadd.xlane.f32.xlu1 %v273_v29  ;;  %v368_v29 = vadd.s32 4294967248, %v1396_v51 }
  0x69   : > { %v371_v56 = vsub.s32 %v368_v29, %v1398_v52  ;;  %v403_v29 = vadd.s32 4294967208, %v1396_v51 }
  0x6a   : > { %277 = vadd.xlane.f32.xlu0 %v276_v34 }
  0x6b   : > { %280 = vadd.xlane.f32.xlu1 %v279_v35 }
  0x6e   : > { %283 = vadd.xlane.f32.xlu0 %v282_v40 }
  0x6f   : > { %286 = vadd.xlane.f32.xlu1 %v285_v41  ;;  %v364_v41 = vsub.s32 %v361_v10, %v1398_v52 }
  0x72   : > { %289 = vadd.xlane.f32.xlu0 %v288_v46  ;;  %v375_v46 = vadd.s32 4294967240, %v1396_v51 }
  0x73   : > { %292 = vadd.xlane.f32.xlu1 %v291_v47 }
  0xdf   : > { %v248_v54 = vpop.xlane.xlu0 %247 }
  0xe0   : > { %v254_v57 = vpop.xlane.xlu1 %253  ;;  %v294_v59 = vmul.f32 0.00390625, %v248_v54 }
  0xe1   : > { %v296_v63 = vmul.f32 0.00390625, %v254_v57  ;;  %v382_v57 = vadd.s32 4294967232, %v1396_v51 }
  0xe2   : > { %v332_v22 = vrot.slane %v294_v59, %v331_v58 }
  0xe3   : > { %v251_v3 = vpop.xlane.xlu0 %250  ;;  %v344_v34 = vrot.slane %v296_v63, %v343_v62 }
  0xe4   : > { %v295_v11 = vmul.f32 0.00390625, %v251_v3  ;;  %v257_v16 = vpop.xlane.xlu1 %256 }
  0xe5   : > { %v297_v17 = vmul.f32 0.00390625, %v257_v16  ;;  %v396_v16 = vadd.s32 4294967216, %v1396_v51 }
  0xe6   : > { %v337_v23 = vrot.slane %v295_v11, %v336_v60  ;;  %v378_v60 = vsub.s32 %v375_v46, %v1398_v52  ;;  %v385_v11 = vsub.s32 %v382_v57, %v1398_v52 }
  0xe7   : > { %v351_v35 = vrot.slane %v297_v17, %v350_v7  ;;  %v260_v40 = vpop.xlane.xlu0 %259 }
  0xe8   : > { %v339_v47 = vsel %vm338_vm1, %v337_v23, %v332_v22  ;;  %v298_v48 = vmul.f32 0.00390625, %v260_v40  ;;  %v263_v49 = vpop.xlane.xlu1 %262 }
  0xe9   : > { %v346_v50 = vsel %vm345_vm2, %v344_v34, %v339_v47  ;;  %v299_v53 = vmul.f32 0.00390625, %v263_v49  ;;  %v399_v47 = vsub.s32 %v396_v16, %v1398_v52 }
  0xea   : > { %v353_v54 = vsel %vm352_vm3, %v351_v35, %v346_v50  ;;  %v358_v55 = vrot.slane %v298_v48, %v357_v28  ;;  %v392_v28 = vsub.s32 %v389_v61, %v1398_v52  ;;  %v410_v48 = vadd.s32 4294967200, %v1396_v51 }
  0xeb   : > { %v365_v58 = vrot.slane %v299_v53, %v364_v41  ;;  %v266_v59 = vpop.xlane.xlu0 %265 }
  0xec   : > { %v360_v62 = vsel %vm359_vm4, %v358_v55, %v353_v54  ;;  %v300_v63 = vmul.f32 0.00390625, %v266_v59  ;;  %v269_v3 = vpop.xlane.xlu1 %268  ;;  %v406_v54 = vsub.s32 %v403_v29, %v1398_v52  ;;  %v417_v55 = vadd.s32 4294967192, %v1396_v51 }
  0xed   : > { %v301_v7 = vmul.f32 0.00390625, %v269_v3  ;;  %v367_v17 = vsel %vm366_vm5, %v365_v58, %v360_v62  ;;  %v413_v61 = vsub.s32 %v410_v48, %v1398_v52  ;;  %v424_v62 = vadd.s32 4294967184, %v1396_v51 }
  0xee   : > { %v372_v10 = vrot.slane %v300_v63, %v371_v56 }
  0xef   : > { %v379_v22 = vrot.slane %v301_v7, %v378_v60  ;;  %v272_v23 = vpop.xlane.xlu0 %271  ;;  %v427_v29 = vsub.s32 %v424_v62, %v1398_v52 }
  0xf0   : > { %v374_v34 = vsel %vm373_vm6, %v372_v10, %v367_v17  ;;  %v302_v35 = vmul.f32 0.00390625, %v272_v23  ;;  %v275_v40 = vpop.xlane.xlu1 %274  ;;  %v420_v10 = vsub.s32 %v417_v55, %v1398_v52 }
  0xf1   : > { %v303_v41 = vmul.f32 0.00390625, %v275_v40  ;;  %v381_v49 = vsel %vm380_vm7, %v379_v22, %v374_v34 }
  0xf2   : > { %v386_v46 = vrot.slane %v302_v35, %v385_v11  ;;  %v431_v11 = vadd.s32 4294967176, %v1396_v51 }
  0xf3   : > { %v393_v50 = vrot.slane %v303_v41, %v392_v28  ;;  %v278_v53 = vpop.xlane.xlu0 %277 }
  0xf4   : > { %v388_v56 = vsel %vm387_vm8, %v386_v46, %v381_v49  ;;  %v304_v57 = vmul.f32 0.00390625, %v278_v53  ;;  %v281_v58 = vpop.xlane.xlu1 %280  ;;  %v434_v41 = vsub.s32 %v431_v11, %v1398_v52 }
  0xf5   : > { %v305_v59 = vmul.f32 0.00390625, %v281_v58  ;;  %v395_v63 = vsel %vm394_vm9, %v393_v50, %v388_v56  ;;  %v510_v56 = vld [vmem:[#allocation7] sm:$0xff] }
  0xf6   : > { %v400_v60 = vrot.slane %v304_v57, %v399_v47  ;;  %860 = vmatpush3.msra.mxu1 %v510_v56 }
  0xf7   : > { %v407_v3 = vrot.slane %v305_v59, %v406_v54  ;;  %v284_v7 = vpop.xlane.xlu0 %283 }
  0xf8   : > { %v402_v16 = vsel %vm401_vm10, %v400_v60, %v395_v63  ;;  %v306_v17 = vmul.f32 0.00390625, %v284_v7  ;;  %v287_v22 = vpop.xlane.xlu1 %286  ;;  %v593_v7 = vsub.s32 0, %v1398_v52 }
  0xf9   : > { %v307_v23 = vmul.f32 0.00390625, %v287_v22  ;;  %v409_v34 = vsel %vm408_vm11, %v407_v3, %v402_v16 }
  0xfa   : > { %v414_v28 = vrot.slane %v306_v17, %v413_v61 }
  0xfb   : > { %v421_v35 = vrot.slane %v307_v23, %v420_v10  ;;  %v290_v40 = vpop.xlane.xlu0 %289 }
  0xfc   : > { %v416_v46 = vsel %vm415_vm12, %v414_v28, %v409_v34  ;;  %v308_v47 = vmul.f32 0.00390625, %v290_v40  ;;  %v293_v48 = vpop.xlane.xlu1 %292 }
  0xfd   : > { %v309_v49 = vmul.f32 0.00390625, %v293_v48  ;;  %v423_v53 = vsel %vm422_vm13, %v421_v35, %v416_v46 }
  0xfe   : > { %v428_v51 = vrot.slane %v308_v47, %v427_v29 }
  0xff   : > { %v435_v50 = vrot.slane %v309_v49, %v434_v41 }
 0x100   : > { %v430_v54 = vsel %vm429_vm14, %v428_v51, %v423_v53 }
 0x101   : > { %v437_v55 = vsel %vm436_vm15, %v435_v50, %v430_v54 }
 0x102   : > { %857 = vmatmul.mubr.f32.vlgmr.msra.gmra.mxu0 %v437_v55 }
 0x1c2   : > { %v505_v57 = vpop.f32.mrf.mxu0 }
 0x1c3   : > { %v509_v58 = vmax.f32 %v505_v57, 0.0 }
 0x1c4   : > { %v858_v59 = vpop.f32.mrf.mxu0 }
 0x1c5   : > { %862 = vmatmul.mubr.msk.f32.vlgmr.msra.gmra.mxu1 %vm511_vm0, %v509_v58 }
 0x285   : > { %v581_v60 = vpop.f32.mrf.mxu1 }
 0x286   : > { %v842_v61 = vmul.f32 -1.442695, %v581_v60 }
 0x287   : > { %v863_v62 = vpop.f32.mrf.mxu1 }
 0x288   : > { %937 = vpow2.f32 %v842_v61 }
 0x295   : > { %v938_v63 = vpop.eup %937 }
 0x296   : > { %v588_v3 = vadd.f32 1.0, %v938_v63 }
 0x298   : > { %939 = vrcp.f32 %v588_v3 }
 0x2a5   : > { %v940_v10 = vpop.eup %939 }
 0x2a6   : > { %v594_v11 = vrot.slane %v940_v10, %v593_v7 }
 0x2a8   : > { %600 = vbcast.lane.b32.xlu1 %v594_v11, 264  ;;  %596 = vbcast.lane.b32.xlu0 %v594_v11, 256 }
 0x2ac   : > { %604 = vbcast.lane.b32.xlu1 %v594_v11, 272  ;;  %612 = vbcast.lane.b32.xlu0 %v594_v11, 288 }
 0x2b0   : > { %608 = vbcast.lane.b32.xlu1 %v594_v11, 280  ;;  %620 = vbcast.lane.b32.xlu0 %v594_v11, 304 }
 0x2b4   : > { %616 = vbcast.lane.b32.xlu1 %v594_v11, 296  ;;  %628 = vbcast.lane.b32.xlu0 %v594_v11, 320 }
 0x2b8   : > { %624 = vbcast.lane.b32.xlu1 %v594_v11, 312  ;;  %636 = vbcast.lane.b32.xlu0 %v594_v11, 336 }
 0x2bc   : > { %632 = vbcast.lane.b32.xlu1 %v594_v11, 328  ;;  %644 = vbcast.lane.b32.xlu0 %v594_v11, 352 }
 0x2c0   : > { %640 = vbcast.lane.b32.xlu1 %v594_v11, 344  ;;  %652 = vbcast.lane.b32.xlu0 %v594_v11, 368 }
 0x2c4   : > { %648 = vbcast.lane.b32.xlu1 %v594_v11, 360 }
 0x2c8   : > { %656 = vbcast.lane.b32.xlu1 %v594_v11, 376 }
 0x31a   : > { %v601_v52 = vpop.permute.xlu1 %600  ;;  %v597_v16 = vpop.permute.xlu0 %596 }
 0x31b   : > { %v660_v17 = vmul.f32 %v601_v52, %v1283_v5  ;;  %v661_v22 = vmul.f32 %v601_v52, %v1286_v6  ;;  %v658_v23 = vmul.f32 %v597_v16, %v1269_v0  ;;  %v659_v28 = vmul.f32 %v597_v16, %v1272_v1 }
 0x31d   : > { %692 = vst [vmem:[%s1440_s23 + $0x10] sm:$0xff] %v660_v17  ;;  %693 = vst [vmem:[%s1440_s23 + $0x18] sm:$0xff] %v661_v22 }
 0x31e   : > { %690 = vst [vmem:[%s1440_s23] sm:$0xff] %v658_v23  ;;  %691 = vst [vmem:[%s1440_s23 + $0x8] sm:$0xff] %v659_v28  ;;  %v605_v5 = vpop.permute.xlu1 %604  ;;  %v613_v0 = vpop.permute.xlu0 %612 }
 0x31f   : > { %v662_v1 = vmul.f32 %v605_v5, %v1275_v2  ;;  %v663_v6 = vmul.f32 %v605_v5, %v1280_v4  ;;  %v666_v29 = vmul.f32 %v613_v0, %v1301_v12  ;;  %v667_v34 = vmul.f32 %v613_v0, %v1304_v13 }
 0x321   : > { %694 = vst [vmem:[%s1440_s23 + $0x20] sm:$0xff] %v662_v1  ;;  %695 = vst [vmem:[%s1440_s23 + $0x28] sm:$0xff] %v663_v6 }
 0x322   : > { %698 = vst [vmem:[%s1440_s23 + $0x40] sm:$0xff] %v666_v29  ;;  %699 = vst [vmem:[%s1440_s23 + $0x48] sm:$0xff] %v667_v34  ;;  %v609_v35 = vpop.permute.xlu1 %608  ;;  %v621_v40 = vpop.permute.xlu0 %620 }
 0x323   : > { %v664_v41 = vmul.f32 %v609_v35, %v1291_v8  ;;  %v665_v2 = vmul.f32 %v609_v35, %v1294_v9  ;;  %v670_v4 = vmul.f32 %v621_v40, %v1317_v18  ;;  %v671_v12 = vmul.f32 %v621_v40, %v1320_v19 }
 0x325   : > { %696 = vst [vmem:[%s1440_s23 + $0x30] sm:$0xff] %v664_v41  ;;  %697 = vst [vmem:[%s1440_s23 + $0x38] sm:$0xff] %v665_v2 }
 0x326   : > { %702 = vst [vmem:[%s1440_s23 + $0x60] sm:$0xff] %v670_v4  ;;  %703 = vst [vmem:[%s1440_s23 + $0x68] sm:$0xff] %v671_v12  ;;  %v617_v13 = vpop.permute.xlu1 %616  ;;  %v629_v46 = vpop.permute.xlu0 %628 }
 0x327   : > { %v668_v47 = vmul.f32 %v617_v13, %v1307_v14  ;;  %v669_v8 = vmul.f32 %v617_v13, %v1310_v15  ;;  %v674_v9 = vmul.f32 %v629_v46, %v1333_v24  ;;  %v675_v18 = vmul.f32 %v629_v46, %v1336_v25 }
 0x329   : > { %700 = vst [vmem:[%s1440_s23 + $0x50] sm:$0xff] %v668_v47  ;;  %701 = vst [vmem:[%s1440_s23 + $0x58] sm:$0xff] %v669_v8 }
 0x32a   : > { %706 = vst [vmem:[%s1440_s23 + $0x80] sm:$0xff] %v674_v9  ;;  %707 = vst [vmem:[%s1440_s23 + $0x88] sm:$0xff] %v675_v18  ;;  %v625_v19 = vpop.permute.xlu1 %624  ;;  %v637_v48 = vpop.permute.xlu0 %636 }
 0x32b   : > { %v672_v49 = vmul.f32 %v625_v19, %v1323_v20  ;;  %v673_v14 = vmul.f32 %v625_v19, %v1326_v21  ;;  %v678_v15 = vmul.f32 %v637_v48, %v1349_v30  ;;  %v679_v24 = vmul.f32 %v637_v48, %v1352_v31 }
 0x32d   : > { %704 = vst [vmem:[%s1440_s23 + $0x70] sm:$0xff] %v672_v49  ;;  %705 = vst [vmem:[%s1440_s23 + $0x78] sm:$0xff] %v673_v14 }
 0x32e   : > { %710 = vst [vmem:[%s1440_s23 + $0xa0] sm:$0xff] %v678_v15  ;;  %711 = vst [vmem:[%s1440_s23 + $0xa8] sm:$0xff] %v679_v24  ;;  %v633_v25 = vpop.permute.xlu1 %632  ;;  %v645_v51 = vpop.permute.xlu0 %644 }
 0x32f   : > { %v676_v50 = vmul.f32 %v633_v25, %v1339_v26  ;;  %v677_v20 = vmul.f32 %v633_v25, %v1342_v27  ;;  %v682_v21 = vmul.f32 %v645_v51, %v1365_v36  ;;  %v683_v30 = vmul.f32 %v645_v51, %v1368_v37 }
 0x331   : > { %708 = vst [vmem:[%s1440_s23 + $0x90] sm:$0xff] %v676_v50  ;;  %709 = vst [vmem:[%s1440_s23 + $0x98] sm:$0xff] %v677_v20 }
 0x332   : > { %714 = vst [vmem:[%s1440_s23 + $0xc0] sm:$0xff] %v682_v21  ;;  %715 = vst [vmem:[%s1440_s23 + $0xc8] sm:$0xff] %v683_v30  ;;  %v641_v31 = vpop.permute.xlu1 %640  ;;  %v653_v53 = vpop.permute.xlu0 %652 }
 0x333   : > { %v680_v26 = vmul.f32 %v641_v31, %v1355_v32  ;;  %v681_v54 = vmul.f32 %v641_v31, %v1358_v33  ;;  %v686_v27 = vmul.f32 %v653_v53, %v1381_v42  ;;  %v687_v36 = vmul.f32 %v653_v53, %v1384_v43 }
 0x335   : > { %712 = vst [vmem:[%s1440_s23 + $0xb0] sm:$0xff] %v680_v26  ;;  %713 = vst [vmem:[%s1440_s23 + $0xb8] sm:$0xff] %v681_v54 }
 0x336   : > { %718 = vst [vmem:[%s1440_s23 + $0xe0] sm:$0xff] %v686_v27  ;;  %719 = vst [vmem:[%s1440_s23 + $0xe8] sm:$0xff] %v687_v36  ;;  %v649_v37 = vpop.permute.xlu1 %648 }
 0x337   : > { %v684_v55 = vmul.f32 %v649_v37, %v1371_v38  ;;  %v685_v56 = vmul.f32 %v649_v37, %v1374_v39 }
 0x339   : > { %716 = vst [vmem:[%s1440_s23 + $0xd0] sm:$0xff] %v684_v55  ;;  %717 = vst [vmem:[%s1440_s23 + $0xd8] sm:$0xff] %v685_v56 }
 0x33a   : > { %v657_v32 = vpop.permute.xlu1 %656 }
 0x33b   : > { %v688_v33 = vmul.f32 %v657_v32, %v1387_v44  ;;  %v689_v38 = vmul.f32 %v657_v32, %v1390_v45 }
 0x33d   : > { %720 = vst [vmem:[%s1440_s23 + $0xf0] sm:$0xff] %v688_v33  ;;  %721 = vst [vmem:[%s1440_s23 + $0xf8] sm:$0xff] %v689_v38 }
 0x33e   : > { %1034 = shalt.err (!%p1031_p12)
}
 0x33f   : > { %s1035_s20 = scalar_lea.hbm %s1503_s29, 4096  ;;  %s1039_s4 = scalar_lea.hbm %s1555_s3, 8192 }
 0x340   : > { %p1036_p6 = scmp.ne.s32.totalorder %s1503_s29, %s1035_s20  ;;  %p1040_p13 = scmp.lt.s32.totalorder %s1503_s29, %s1555_s3 }
 0x341   : > { %p1041_p3 = scmp.lt.s32.totalorder %s1039_s4, %s1035_s20 }
 0x342   : > { %p1037_p7 = pnand %p1036_p6, %p1572_p0 }
 0x343   : > { %p1042_p8 = por %p1041_p3, %p1040_p13 }
 0x344   : > { %p1038_p11 = pneg %p1037_p7 }
 0x346   : > { %p1043_p2 = pnand %p1042_p8, %p1038_p11 }
 0x348   : > { %1046 = shalt.err (!%p1043_p2)
}
 0x349   : > { %s1099_s10 = smov 256   ;;  %s1100_s23 = smov 16  }
 0x34a   : > { %874 = dma.vmem_to_hbm [thread:$0]  (%p1572_p0), %s1505_s30, 4096, %s1503_s29, %s723_s16, %s1099_s10, %s1099_s10, %s1100_s23  }
 0x34b PF: > { %s751_s26 = sand.u32 1, %s1077_s12   ;;  %p1573_p4 = scmp.ne.s32.totalorder %s1563_s25, 0 }
 0x34c   : > { %p1574_p5 = scmp.ge.s32.totalorder %s1089_s15, 2  ;;  %s752_s28 = scalar_lea.sflag [#allocation4], %s751_s26 }
 0x34e   : > { %p888_p9 = pnand %p1574_p5, %p1573_p4 }
 0x350   : > { %p889_p10 = pneg %p888_p9 }
 0x352   : > { %1072 = dma.done.wait (%p889_p10), %s752_s28, 4096  }
 0x353   : > { %1074 = vsyncadd (%p889_p10), %s752_s28, 4294963200  ;;  %p17_p1 = scmp.ge.s32.totalorder %s1146_s18, 4   ;;  %s1575_s12 = smov %s1081_s13 }
 0x354   : > { %s1576_s13 = smov %s1085_s14  ;;  %s1577_s14 = smov %s1158_s21 }
 0x355   : > { %s1578_s15 = smov %s1146_s18  ;;  %19 = sbr.rel (!%p17_p1) target bundleno = 6 (0x6), region = 85 }
 0x35a   :  { %757 = vsyncpa [#allocation3], 1 }
 0x35b   :  { %759 = vsyncpa [#allocation3 + $0x1], 1 }
 0x35c   :  { %760 = vsyncpa [#allocation6], 1 }
 0x35d   :  { %761 = vsyncpa [#allocation4], 1 }
 0x35e   :  { %763 = vsyncpa [#allocation4 + $0x1], 1 }

</bundles_post_ra>
